<compile_context>
chip_gen: v7x
topology: tpu7x:2x2x1
jax: 0.10.0
libtpu: 0.0.40
codegen_flags: <defaults>
</compile_context>

<pallas_src>
import jax
import jax.numpy as jnp
from jax.experimental import pallas as pl
from jax.experimental.pallas import tpu as pltpu

_CHUNK = 8  # rows gathered per grid step (sublane-dense output blocks)


def _gather_rows_kernel(ids_ref, table_hbm, out_ref, sem):
    # ids_ref:   SMEM scalar-prefetch ref, (Np,) int32 row ids (pre-clamped).
    # table_hbm: raw (V, Hp) table ref left in place (memory_space=pl.ANY).
    # out_ref:   VMEM output block, (CHUNK, Hp).
    # sem:       DMA semaphores, (CHUNK,).
    rows_per_step = out_ref.shape[0]
    base = pl.program_id(0) * rows_per_step

    # Issue all per-row DMAs first (CHUNK outstanding copies), then wait.
    copies = []
    for j in range(rows_per_step):  # static unroll
        row = ids_ref[base + j]
        cp = pltpu.make_async_copy(
            table_hbm.at[pl.ds(row, 1), :],   # one (1, Hp) row from HBM
            out_ref.at[pl.ds(j, 1), :],       # straight into the output block
            sem.at[j],
        )
        cp.start()
        copies.append(cp)
    for cp in copies:
        cp.wait()


def pad_embedding_table(table):
    """One-time init: pad the last dim of the (V, H) table to a multiple of 128.

    Do this once when the module is built, NOT per forward call.
    """
    V, H = table.shape
    Hp = ((H + 127) // 128) * 128
    if Hp != H:
        table = jnp.pad(table, ((0, 0), (0, Hp - H)))
    return table


def embedding_lookup(ids, table_padded):
    """Batched gather: ids (N,) int -> (N, Hp) rows of the padded table."""
    V, Hp = table_padded.shape
    assert Hp % 128 == 0, "pad the table once at init with pad_embedding_table()"

    ids = jnp.clip(jnp.asarray(ids, dtype=jnp.int32).reshape(-1), 0, V - 1)
    N = ids.shape[0]
    Np = ((N + _CHUNK - 1) // _CHUNK) * _CHUNK
    if Np != N:
        ids = jnp.pad(ids, (0, Np - N))  # padded slots gather row 0, discarded
    n_chunks = Np // _CHUNK

    itemsize = jnp.dtype(table_padded.dtype).itemsize

    out = pl.pallas_call(
        _gather_rows_kernel,
        out_shape=jax.ShapeDtypeStruct((Np, Hp), table_padded.dtype),
        grid_spec=pltpu.PrefetchScalarGridSpec(
            num_scalar_prefetch=1,
            grid=(n_chunks,),
            in_specs=[pl.BlockSpec(memory_space=pl.ANY)],  # table stays in HBM
            out_specs=pl.BlockSpec((_CHUNK, Hp), lambda i, ids_pref: (i, 0)),
            scratch_shapes=[pltpu.SemaphoreType.DMA((_CHUNK,))],
        ),
        compiler_params=pltpu.CompilerParams(
            dimension_semantics=("parallel",)  # megacore split on v7x
        ),
        cost_estimate=pl.CostEstimate(
            flops=0, transcendentals=0, bytes_accessed=2 * Np * Hp * itemsize
        ),
    )(ids, table_padded)

    return out[:N]


def embedding_forward(word, table_padded, hidden_size):
    """Matches Embedding.forward: embedding(word).view(1, 1, -1) -> (1,1,H)."""
    rows = embedding_lookup(jnp.asarray(word, dtype=jnp.int32).reshape((1,)),
                            table_padded)
    return rows[:, :hidden_size].reshape(1, 1, hidden_size)


if __name__ == "__main__":
    # Small shapes consistent with the module (vocab 64; hidden 96 deliberately
    # NOT a multiple of 128 so the init-time padding path is exercised).
    input_size = 64
    hidden_size = 96

    key = jax.random.PRNGKey(0)
    # nn.Embedding default init: weight ~ N(0, 1)
    table_raw = jax.random.normal(key, (input_size, hidden_size), dtype=jnp.float32)
    table = pad_embedding_table(table_raw)  # padded ONCE at init

    # ---- single-word forward (the module's forward) ----
    word = jnp.int32(7)
    out = jax.block_until_ready(embedding_forward(word, table, hidden_size))
    ref = table_raw[7].reshape(1, 1, -1)
    assert out.shape == (1, 1, hidden_size)
    assert jnp.allclose(out, ref), "mismatch vs reference embedding lookup"

    # ---- batched lookup (amortizes per-call overhead over N tokens) ----
    ids = jnp.array([3, 7, 0, 63, 12, 13, 13, 1, 5, 42], dtype=jnp.int32)  # N=10
    rows = jax.block_until_ready(embedding_lookup(ids, table))[:, :hidden_size]
    ref_rows = table_raw[ids]
    assert rows.shape == (ids.shape[0], hidden_size)
    assert jnp.allclose(rows, ref_rows), "mismatch vs reference (batched path)"

    # TODO(synk): PyTorch nn.Embedding raises on out-of-range indices; this
    # implementation clamps them to [0, V) for bounds safety instead.

    print("KERNEL_OK")
</pallas_src>

<mosaic_0001>
module attributes {stable_mosaic.version = 11 : i64} {
  func.func @_gather_rows_kernel(%arg0: i32, %arg1: memref<8xi32, #tpu.memory_space<smem>>, %arg2: memref<64x128xf32, #tpu.memory_space<any>>, %arg3: memref<8x128xf32, #tpu.memory_space<vmem>>, %arg4: memref<8x!tpu.dma_semaphore, #tpu.memory_space<semaphore_mem>>) attributes {dimension_semantics = [#tpu.dimension_semantics<parallel>], iteration_bounds = array<i64: 1>, scalar_prefetch = 1 : i64, scratch_operands = 1 : i64, tpu.core_type = #tpu.core_type<tc>, window_params = [{}, {transform_indices = @transform_1, window_bounds = array<i64: 8, 128>}]} {
    %c8_i32 = arith.constant 8 : i32
    %0 = arith.muli %arg0, %c8_i32 : i32
    %c0_i32 = arith.constant 0 : i32
    %1 = arith.addi %0, %c0_i32 : i32
    %2 = arith.index_cast %1 : i32 to index
    %3 = memref.load %arg1[%2] : memref<8xi32, #tpu.memory_space<smem>>
    %c0_i32_0 = arith.constant 0 : i32
    %c0_i32_1 = arith.constant 0 : i32
    %4 = tpu.memref_slice %arg2[%3, %c0_i32_1] : memref<64x128xf32, #tpu.memory_space<any>> -> memref<1x128xf32, #tpu.memory_space<any>>
    %c0_i32_2 = arith.constant 0 : i32
    %c0_i32_3 = arith.constant 0 : i32
    %5 = tpu.memref_slice %arg3[%c0_i32_2, %c0_i32_3] : memref<8x128xf32, #tpu.memory_space<vmem>> -> memref<1x128xf32, #tpu.memory_space<vmem>>
    %6 = tpu.memref_slice %arg4[%c0_i32_0] : memref<8x!tpu.dma_semaphore, #tpu.memory_space<semaphore_mem>> -> memref<1x!tpu.dma_semaphore, #tpu.memory_space<semaphore_mem>>
    %7 = tpu.memref_squeeze %6 : memref<1x!tpu.dma_semaphore, #tpu.memory_space<semaphore_mem>> -> memref<!tpu.dma_semaphore, #tpu.memory_space<semaphore_mem>>
    tpu.enqueue_dma source(%4 : memref<1x128xf32, #tpu.memory_space<any>>) target(%5 : memref<1x128xf32, #tpu.memory_space<vmem>>) target_semaphore(%7 : memref<!tpu.dma_semaphore, #tpu.memory_space<semaphore_mem>>)
    %c1_i32 = arith.constant 1 : i32
    %8 = arith.addi %0, %c1_i32 : i32
    %9 = arith.index_cast %8 : i32 to index
    %10 = memref.load %arg1[%9] : memref<8xi32, #tpu.memory_space<smem>>
    %c1_i32_4 = arith.constant 1 : i32
    %c0_i32_5 = arith.constant 0 : i32
    %11 = tpu.memref_slice %arg2[%10, %c0_i32_5] : memref<64x128xf32, #tpu.memory_space<any>> -> memref<1x128xf32, #tpu.memory_space<any>>
    %c1_i32_6 = arith.constant 1 : i32
    %c0_i32_7 = arith.constant 0 : i32
    %12 = tpu.memref_slice %arg3[%c1_i32_6, %c0_i32_7] : memref<8x128xf32, #tpu.memory_space<vmem>> -> memref<1x128xf32, #tpu.memory_space<vmem>>
    %13 = tpu.memref_slice %arg4[%c1_i32_4] : memref<8x!tpu.dma_semaphore, #tpu.memory_space<semaphore_mem>> -> memref<1x!tpu.dma_semaphore, #tpu.memory_space<semaphore_mem>>
    %14 = tpu.memref_squeeze %13 : memref<1x!tpu.dma_semaphore, #tpu.memory_space<semaphore_mem>> -> memref<!tpu.dma_semaphore, #tpu.memory_space<semaphore_mem>>
    tpu.enqueue_dma source(%11 : memref<1x128xf32, #tpu.memory_space<any>>) target(%12 : memref<1x128xf32, #tpu.memory_space<vmem>>) target_semaphore(%14 : memref<!tpu.dma_semaphore, #tpu.memory_space<semaphore_mem>>)
    %c2_i32 = arith.constant 2 : i32
    %15 = arith.addi %0, %c2_i32 : i32
    %16 = arith.index_cast %15 : i32 to index
    %17 = memref.load %arg1[%16] : memref<8xi32, #tpu.memory_space<smem>>
    %c2_i32_8 = arith.constant 2 : i32
    %c0_i32_9 = arith.constant 0 : i32
    %18 = tpu.memref_slice %arg2[%17, %c0_i32_9] : memref<64x128xf32, #tpu.memory_space<any>> -> memref<1x128xf32, #tpu.memory_space<any>>
    %c2_i32_10 = arith.constant 2 : i32
    %c0_i32_11 = arith.constant 0 : i32
    %19 = tpu.memref_slice %arg3[%c2_i32_10, %c0_i32_11] : memref<8x128xf32, #tpu.memory_space<vmem>> -> memref<1x128xf32, #tpu.memory_space<vmem>>
    %20 = tpu.memref_slice %arg4[%c2_i32_8] : memref<8x!tpu.dma_semaphore, #tpu.memory_space<semaphore_mem>> -> memref<1x!tpu.dma_semaphore, #tpu.memory_space<semaphore_mem>>
    %21 = tpu.memref_squeeze %20 : memref<1x!tpu.dma_semaphore, #tpu.memory_space<semaphore_mem>> -> memref<!tpu.dma_semaphore, #tpu.memory_space<semaphore_mem>>
    tpu.enqueue_dma source(%18 : memref<1x128xf32, #tpu.memory_space<any>>) target(%19 : memref<1x128xf32, #tpu.memory_space<vmem>>) target_semaphore(%21 : memref<!tpu.dma_semaphore, #tpu.memory_space<semaphore_mem>>)
    %c3_i32 = arith.constant 3 : i32
    %22 = arith.addi %0, %c3_i32 : i32
    %23 = arith.index_cast %22 : i32 to index
    %24 = memref.load %arg1[%23] : memref<8xi32, #tpu.memory_space<smem>>
    %c3_i32_12 = arith.constant 3 : i32
    %c0_i32_13 = arith.constant 0 : i32
    %25 = tpu.memref_slice %arg2[%24, %c0_i32_13] : memref<64x128xf32, #tpu.memory_space<any>> -> memref<1x128xf32, #tpu.memory_space<any>>
    %c3_i32_14 = arith.constant 3 : i32
    %c0_i32_15 = arith.constant 0 : i32
    %26 = tpu.memref_slice %arg3[%c3_i32_14, %c0_i32_15] : memref<8x128xf32, #tpu.memory_space<vmem>> -> memref<1x128xf32, #tpu.memory_space<vmem>>
    %27 = tpu.memref_slice %arg4[%c3_i32_12] : memref<8x!tpu.dma_semaphore, #tpu.memory_space<semaphore_mem>> -> memref<1x!tpu.dma_semaphore, #tpu.memory_space<semaphore_mem>>
    %28 = tpu.memref_squeeze %27 : memref<1x!tpu.dma_semaphore, #tpu.memory_space<semaphore_mem>> -> memref<!tpu.dma_semaphore, #tpu.memory_space<semaphore_mem>>
    tpu.enqueue_dma source(%25 : memref<1x128xf32, #tpu.memory_space<any>>) target(%26 : memref<1x128xf32, #tpu.memory_space<vmem>>) target_semaphore(%28 : memref<!tpu.dma_semaphore, #tpu.memory_space<semaphore_mem>>)
    %c4_i32 = arith.constant 4 : i32
    %29 = arith.addi %0, %c4_i32 : i32
    %30 = arith.index_cast %29 : i32 to index
    %31 = memref.load %arg1[%30] : memref<8xi32, #tpu.memory_space<smem>>
    %c4_i32_16 = arith.constant 4 : i32
    %c0_i32_17 = arith.constant 0 : i32
    %32 = tpu.memref_slice %arg2[%31, %c0_i32_17] : memref<64x128xf32, #tpu.memory_space<any>> -> memref<1x128xf32, #tpu.memory_space<any>>
    %c4_i32_18 = arith.constant 4 : i32
    %c0_i32_19 = arith.constant 0 : i32
    %33 = tpu.memref_slice %arg3[%c4_i32_18, %c0_i32_19] : memref<8x128xf32, #tpu.memory_space<vmem>> -> memref<1x128xf32, #tpu.memory_space<vmem>>
    %34 = tpu.memref_slice %arg4[%c4_i32_16] : memref<8x!tpu.dma_semaphore, #tpu.memory_space<semaphore_mem>> -> memref<1x!tpu.dma_semaphore, #tpu.memory_space<semaphore_mem>>
    %35 = tpu.memref_squeeze %34 : memref<1x!tpu.dma_semaphore, #tpu.memory_space<semaphore_mem>> -> memref<!tpu.dma_semaphore, #tpu.memory_space<semaphore_mem>>
    tpu.enqueue_dma source(%32 : memref<1x128xf32, #tpu.memory_space<any>>) target(%33 : memref<1x128xf32, #tpu.memory_space<vmem>>) target_semaphore(%35 : memref<!tpu.dma_semaphore, #tpu.memory_space<semaphore_mem>>)
    %c5_i32 = arith.constant 5 : i32
    %36 = arith.addi %0, %c5_i32 : i32
    %37 = arith.index_cast %36 : i32 to index
    %38 = memref.load %arg1[%37] : memref<8xi32, #tpu.memory_space<smem>>
    %c5_i32_20 = arith.constant 5 : i32
    %c0_i32_21 = arith.constant 0 : i32
    %39 = tpu.memref_slice %arg2[%38, %c0_i32_21] : memref<64x128xf32, #tpu.memory_space<any>> -> memref<1x128xf32, #tpu.memory_space<any>>
    %c5_i32_22 = arith.constant 5 : i32
    %c0_i32_23 = arith.constant 0 : i32
    %40 = tpu.memref_slice %arg3[%c5_i32_22, %c0_i32_23] : memref<8x128xf32, #tpu.memory_space<vmem>> -> memref<1x128xf32, #tpu.memory_space<vmem>>
    %41 = tpu.memref_slice %arg4[%c5_i32_20] : memref<8x!tpu.dma_semaphore, #tpu.memory_space<semaphore_mem>> -> memref<1x!tpu.dma_semaphore, #tpu.memory_space<semaphore_mem>>
    %42 = tpu.memref_squeeze %41 : memref<1x!tpu.dma_semaphore, #tpu.memory_space<semaphore_mem>> -> memref<!tpu.dma_semaphore, #tpu.memory_space<semaphore_mem>>
    tpu.enqueue_dma source(%39 : memref<1x128xf32, #tpu.memory_space<any>>) target(%40 : memref<1x128xf32, #tpu.memory_space<vmem>>) target_semaphore(%42 : memref<!tpu.dma_semaphore, #tpu.memory_space<semaphore_mem>>)
    %c6_i32 = arith.constant 6 : i32
    %43 = arith.addi %0, %c6_i32 : i32
    %44 = arith.index_cast %43 : i32 to index
    %45 = memref.load %arg1[%44] : memref<8xi32, #tpu.memory_space<smem>>
    %c6_i32_24 = arith.constant 6 : i32
    %c0_i32_25 = arith.constant 0 : i32
    %46 = tpu.memref_slice %arg2[%45, %c0_i32_25] : memref<64x128xf32, #tpu.memory_space<any>> -> memref<1x128xf32, #tpu.memory_space<any>>
    %c6_i32_26 = arith.constant 6 : i32
    %c0_i32_27 = arith.constant 0 : i32
    %47 = tpu.memref_slice %arg3[%c6_i32_26, %c0_i32_27] : memref<8x128xf32, #tpu.memory_space<vmem>> -> memref<1x128xf32, #tpu.memory_space<vmem>>
    %48 = tpu.memref_slice %arg4[%c6_i32_24] : memref<8x!tpu.dma_semaphore, #tpu.memory_space<semaphore_mem>> -> memref<1x!tpu.dma_semaphore, #tpu.memory_space<semaphore_mem>>
    %49 = tpu.memref_squeeze %48 : memref<1x!tpu.dma_semaphore, #tpu.memory_space<semaphore_mem>> -> memref<!tpu.dma_semaphore, #tpu.memory_space<semaphore_mem>>
    tpu.enqueue_dma source(%46 : memref<1x128xf32, #tpu.memory_space<any>>) target(%47 : memref<1x128xf32, #tpu.memory_space<vmem>>) target_semaphore(%49 : memref<!tpu.dma_semaphore, #tpu.memory_space<semaphore_mem>>)
    %c7_i32 = arith.constant 7 : i32
    %50 = arith.addi %0, %c7_i32 : i32
    %51 = arith.index_cast %50 : i32 to index
    %52 = memref.load %arg1[%51] : memref<8xi32, #tpu.memory_space<smem>>
    %c7_i32_28 = arith.constant 7 : i32
    %c0_i32_29 = arith.constant 0 : i32
    %53 = tpu.memref_slice %arg2[%52, %c0_i32_29] : memref<64x128xf32, #tpu.memory_space<any>> -> memref<1x128xf32, #tpu.memory_space<any>>
    %c7_i32_30 = arith.constant 7 : i32
    %c0_i32_31 = arith.constant 0 : i32
    %54 = tpu.memref_slice %arg3[%c7_i32_30, %c0_i32_31] : memref<8x128xf32, #tpu.memory_space<vmem>> -> memref<1x128xf32, #tpu.memory_space<vmem>>
    %55 = tpu.memref_slice %arg4[%c7_i32_28] : memref<8x!tpu.dma_semaphore, #tpu.memory_space<semaphore_mem>> -> memref<1x!tpu.dma_semaphore, #tpu.memory_space<semaphore_mem>>
    %56 = tpu.memref_squeeze %55 : memref<1x!tpu.dma_semaphore, #tpu.memory_space<semaphore_mem>> -> memref<!tpu.dma_semaphore, #tpu.memory_space<semaphore_mem>>
    tpu.enqueue_dma source(%53 : memref<1x128xf32, #tpu.memory_space<any>>) target(%54 : memref<1x128xf32, #tpu.memory_space<vmem>>) target_semaphore(%56 : memref<!tpu.dma_semaphore, #tpu.memory_space<semaphore_mem>>)
    %c0_i32_32 = arith.constant 0 : i32
    %c0_i32_33 = arith.constant 0 : i32
    %57 = tpu.memref_slice %arg2[%3, %c0_i32_33] : memref<64x128xf32, #tpu.memory_space<any>> -> memref<1x128xf32, #tpu.memory_space<any>>
    %c0_i32_34 = arith.constant 0 : i32
    %c0_i32_35 = arith.constant 0 : i32
    %58 = tpu.memref_slice %arg3[%c0_i32_34, %c0_i32_35] : memref<8x128xf32, #tpu.memory_space<vmem>> -> memref<1x128xf32, #tpu.memory_space<vmem>>
    %59 = tpu.memref_slice %arg4[%c0_i32_32] : memref<8x!tpu.dma_semaphore, #tpu.memory_space<semaphore_mem>> -> memref<1x!tpu.dma_semaphore, #tpu.memory_space<semaphore_mem>>
    %60 = tpu.memref_squeeze %59 : memref<1x!tpu.dma_semaphore, #tpu.memory_space<semaphore_mem>> -> memref<!tpu.dma_semaphore, #tpu.memory_space<semaphore_mem>>
    tpu.wait_dma2 semaphore(%60 : memref<!tpu.dma_semaphore, #tpu.memory_space<semaphore_mem>>) src(%57 : memref<1x128xf32, #tpu.memory_space<any>>) dst(%58 : memref<1x128xf32, #tpu.memory_space<vmem>>)
    %c1_i32_36 = arith.constant 1 : i32
    %c0_i32_37 = arith.constant 0 : i32
    %61 = tpu.memref_slice %arg2[%10, %c0_i32_37] : memref<64x128xf32, #tpu.memory_space<any>> -> memref<1x128xf32, #tpu.memory_space<any>>
    %c1_i32_38 = arith.constant 1 : i32
    %c0_i32_39 = arith.constant 0 : i32
    %62 = tpu.memref_slice %arg3[%c1_i32_38, %c0_i32_39] : memref<8x128xf32, #tpu.memory_space<vmem>> -> memref<1x128xf32, #tpu.memory_space<vmem>>
    %63 = tpu.memref_slice %arg4[%c1_i32_36] : memref<8x!tpu.dma_semaphore, #tpu.memory_space<semaphore_mem>> -> memref<1x!tpu.dma_semaphore, #tpu.memory_space<semaphore_mem>>
    %64 = tpu.memref_squeeze %63 : memref<1x!tpu.dma_semaphore, #tpu.memory_space<semaphore_mem>> -> memref<!tpu.dma_semaphore, #tpu.memory_space<semaphore_mem>>
    tpu.wait_dma2 semaphore(%64 : memref<!tpu.dma_semaphore, #tpu.memory_space<semaphore_mem>>) src(%61 : memref<1x128xf32, #tpu.memory_space<any>>) dst(%62 : memref<1x128xf32, #tpu.memory_space<vmem>>)
    %c2_i32_40 = arith.constant 2 : i32
    %c0_i32_41 = arith.constant 0 : i32
    %65 = tpu.memref_slice %arg2[%17, %c0_i32_41] : memref<64x128xf32, #tpu.memory_space<any>> -> memref<1x128xf32, #tpu.memory_space<any>>
    %c2_i32_42 = arith.constant 2 : i32
    %c0_i32_43 = arith.constant 0 : i32
    %66 = tpu.memref_slice %arg3[%c2_i32_42, %c0_i32_43] : memref<8x128xf32, #tpu.memory_space<vmem>> -> memref<1x128xf32, #tpu.memory_space<vmem>>
    %67 = tpu.memref_slice %arg4[%c2_i32_40] : memref<8x!tpu.dma_semaphore, #tpu.memory_space<semaphore_mem>> -> memref<1x!tpu.dma_semaphore, #tpu.memory_space<semaphore_mem>>
    %68 = tpu.memref_squeeze %67 : memref<1x!tpu.dma_semaphore, #tpu.memory_space<semaphore_mem>> -> memref<!tpu.dma_semaphore, #tpu.memory_space<semaphore_mem>>
    tpu.wait_dma2 semaphore(%68 : memref<!tpu.dma_semaphore, #tpu.memory_space<semaphore_mem>>) src(%65 : memref<1x128xf32, #tpu.memory_space<any>>) dst(%66 : memref<1x128xf32, #tpu.memory_space<vmem>>)
    %c3_i32_44 = arith.constant 3 : i32
    %c0_i32_45 = arith.constant 0 : i32
    %69 = tpu.memref_slice %arg2[%24, %c0_i32_45] : memref<64x128xf32, #tpu.memory_space<any>> -> memref<1x128xf32, #tpu.memory_space<any>>
    %c3_i32_46 = arith.constant 3 : i32
    %c0_i32_47 = arith.constant 0 : i32
    %70 = tpu.memref_slice %arg3[%c3_i32_46, %c0_i32_47] : memref<8x128xf32, #tpu.memory_space<vmem>> -> memref<1x128xf32, #tpu.memory_space<vmem>>
    %71 = tpu.memref_slice %arg4[%c3_i32_44] : memref<8x!tpu.dma_semaphore, #tpu.memory_space<semaphore_mem>> -> memref<1x!tpu.dma_semaphore, #tpu.memory_space<semaphore_mem>>
    %72 = tpu.memref_squeeze %71 : memref<1x!tpu.dma_semaphore, #tpu.memory_space<semaphore_mem>> -> memref<!tpu.dma_semaphore, #tpu.memory_space<semaphore_mem>>
    tpu.wait_dma2 semaphore(%72 : memref<!tpu.dma_semaphore, #tpu.memory_space<semaphore_mem>>) src(%69 : memref<1x128xf32, #tpu.memory_space<any>>) dst(%70 : memref<1x128xf32, #tpu.memory_space<vmem>>)
    %c4_i32_48 = arith.constant 4 : i32
    %c0_i32_49 = arith.constant 0 : i32
    %73 = tpu.memref_slice %arg2[%31, %c0_i32_49] : memref<64x128xf32, #tpu.memory_space<any>> -> memref<1x128xf32, #tpu.memory_space<any>>
    %c4_i32_50 = arith.constant 4 : i32
    %c0_i32_51 = arith.constant 0 : i32
    %74 = tpu.memref_slice %arg3[%c4_i32_50, %c0_i32_51] : memref<8x128xf32, #tpu.memory_space<vmem>> -> memref<1x128xf32, #tpu.memory_space<vmem>>
    %75 = tpu.memref_slice %arg4[%c4_i32_48] : memref<8x!tpu.dma_semaphore, #tpu.memory_space<semaphore_mem>> -> memref<1x!tpu.dma_semaphore, #tpu.memory_space<semaphore_mem>>
    %76 = tpu.memref_squeeze %75 : memref<1x!tpu.dma_semaphore, #tpu.memory_space<semaphore_mem>> -> memref<!tpu.dma_semaphore, #tpu.memory_space<semaphore_mem>>
    tpu.wait_dma2 semaphore(%76 : memref<!tpu.dma_semaphore, #tpu.memory_space<semaphore_mem>>) src(%73 : memref<1x128xf32, #tpu.memory_space<any>>) dst(%74 : memref<1x128xf32, #tpu.memory_space<vmem>>)
    %c5_i32_52 = arith.constant 5 : i32
    %c0_i32_53 = arith.constant 0 : i32
    %77 = tpu.memref_slice %arg2[%38, %c0_i32_53] : memref<64x128xf32, #tpu.memory_space<any>> -> memref<1x128xf32, #tpu.memory_space<any>>
    %c5_i32_54 = arith.constant 5 : i32
    %c0_i32_55 = arith.constant 0 : i32
    %78 = tpu.memref_slice %arg3[%c5_i32_54, %c0_i32_55] : memref<8x128xf32, #tpu.memory_space<vmem>> -> memref<1x128xf32, #tpu.memory_space<vmem>>
    %79 = tpu.memref_slice %arg4[%c5_i32_52] : memref<8x!tpu.dma_semaphore, #tpu.memory_space<semaphore_mem>> -> memref<1x!tpu.dma_semaphore, #tpu.memory_space<semaphore_mem>>
    %80 = tpu.memref_squeeze %79 : memref<1x!tpu.dma_semaphore, #tpu.memory_space<semaphore_mem>> -> memref<!tpu.dma_semaphore, #tpu.memory_space<semaphore_mem>>
    tpu.wait_dma2 semaphore(%80 : memref<!tpu.dma_semaphore, #tpu.memory_space<semaphore_mem>>) src(%77 : memref<1x128xf32, #tpu.memory_space<any>>) dst(%78 : memref<1x128xf32, #tpu.memory_space<vmem>>)
    %c6_i32_56 = arith.constant 6 : i32
    %c0_i32_57 = arith.constant 0 : i32
    %81 = tpu.memref_slice %arg2[%45, %c0_i32_57] : memref<64x128xf32, #tpu.memory_space<any>> -> memref<1x128xf32, #tpu.memory_space<any>>
    %c6_i32_58 = arith.constant 6 : i32
    %c0_i32_59 = arith.constant 0 : i32
    %82 = tpu.memref_slice %arg3[%c6_i32_58, %c0_i32_59] : memref<8x128xf32, #tpu.memory_space<vmem>> -> memref<1x128xf32, #tpu.memory_space<vmem>>
    %83 = tpu.memref_slice %arg4[%c6_i32_56] : memref<8x!tpu.dma_semaphore, #tpu.memory_space<semaphore_mem>> -> memref<1x!tpu.dma_semaphore, #tpu.memory_space<semaphore_mem>>
    %84 = tpu.memref_squeeze %83 : memref<1x!tpu.dma_semaphore, #tpu.memory_space<semaphore_mem>> -> memref<!tpu.dma_semaphore, #tpu.memory_space<semaphore_mem>>
    tpu.wait_dma2 semaphore(%84 : memref<!tpu.dma_semaphore, #tpu.memory_space<semaphore_mem>>) src(%81 : memref<1x128xf32, #tpu.memory_space<any>>) dst(%82 : memref<1x128xf32, #tpu.memory_space<vmem>>)
    %c7_i32_60 = arith.constant 7 : i32
    %c0_i32_61 = arith.constant 0 : i32
    %85 = tpu.memref_slice %arg2[%52, %c0_i32_61] : memref<64x128xf32, #tpu.memory_space<any>> -> memref<1x128xf32, #tpu.memory_space<any>>
    %c7_i32_62 = arith.constant 7 : i32
    %c0_i32_63 = arith.constant 0 : i32
    %86 = tpu.memref_slice %arg3[%c7_i32_62, %c0_i32_63] : memref<8x128xf32, #tpu.memory_space<vmem>> -> memref<1x128xf32, #tpu.memory_space<vmem>>
    %87 = tpu.memref_slice %arg4[%c7_i32_60] : memref<8x!tpu.dma_semaphore, #tpu.memory_space<semaphore_mem>> -> memref<1x!tpu.dma_semaphore, #tpu.memory_space<semaphore_mem>>
    %88 = tpu.memref_squeeze %87 : memref<1x!tpu.dma_semaphore, #tpu.memory_space<semaphore_mem>> -> memref<!tpu.dma_semaphore, #tpu.memory_space<semaphore_mem>>
    tpu.wait_dma2 semaphore(%88 : memref<!tpu.dma_semaphore, #tpu.memory_space<semaphore_mem>>) src(%85 : memref<1x128xf32, #tpu.memory_space<any>>) dst(%86 : memref<1x128xf32, #tpu.memory_space<vmem>>)
    return
  }
  func.func @transform_1(%arg0: i32, %arg1: memref<8xi32, #tpu.memory_space<smem>>) -> (i32, i32) {
    %c0_i32 = arith.constant 0 : i32
    %c0_i32_0 = arith.constant 0 : i32
    return %arg0, %c0_i32 : i32, i32
  }
}

</mosaic_0001>

<bundles_post_ra>
// kernel: tpu_custom_call.1
= control target key start
LH: loop header
LB: loop body
LE: loop exit
PB: predicated region body
PF: predicated region fallthrough
CT: control target
= control target key end

     0   :  { %s711_s0 = inlined_call_operand.hbm [shape: s32[8], index: 0, kind: input, shape index: {}]   ;;  %s712_s1 = inlined_call_operand.hbm [shape: f32[64,128], index: 1, kind: input, shape index: {}]   ;;  %s713_s2 = inlined_call_operand.hbm [shape: f32[8,128], index: 2, kind: output, shape index: {}]  }
   0x1   :  { %s280_s11 = scalar_lea.hbm %s711_s0, 16 }
   0x2   :  { %p281_p0 = scmp.ne.s32.totalorder %s711_s0, %s280_s11  ;;  %p284_p1 = scmp.lt.u32.totalorder %s280_s11, %s711_s0 }
   0x4   :  { %p286_p2 = pnand %p284_p1, %p281_p0 }
   0x6   :  { %289 = shalt.err (!%p286_p2)  }
   0x7   :  { %s524_s16 = smov [#allocation4]  }
   0x8   :  { %8 = dma.hbm_to_smem %s711_s0, 16, %s524_s16, [#allocation3] }
   0x9   :  { %504 = dma.done.wait [#allocation3], 16 }
   0xa   :  { %505 = vsyncadd [#allocation3], 4294967280 }
   0xb   :  { %10 = sfence }
   0xc   :  { %11 = vsyncpa [#allocation6], 0  ;;  %s13_s19 = sld [smem:[#allocation4]]  ;;  %s525_s20 = smov [#allocation5]  }
   0xd   :  { %s23_s21 = sshll.u32 %s525_s20, 4  ;;  %s560_s22 = sld [smem:[#allocation4 + $0x1]]  ;;  %s562_s21 = int_to_ptr.vmem [resolvable:$true] %s23_s21 }
   0xe   :  { %s526_s23 = smov [#allocation5 + $0x1]   ;;  %s564_s25 = sld [smem:[#allocation4 + $0x2]] }
   0xf   :  { %s40_s24 = sshll.u32 %s526_s23, 4  ;;  %s527_s26 = smov [#allocation5 + $0x2]   ;;  %s566_s24 = int_to_ptr.vmem [resolvable:$true] %s40_s24 }
  0x10   :  { %s57_s0 = sshll.u32 %s527_s26, 4  ;;  %s568_s27 = sld [smem:[#allocation4 + $0x3]]  ;;  %s570_s0 = int_to_ptr.vmem [resolvable:$true] %s57_s0 }
  0x11   :  { %s579_s8 = scalar_lea.hbm %s712_s1, 1024 }
  0x12   :  { %s248_s28 = sshll.u32 %s13_s19, 4 }
  0x13   :  { %s15_s3 = scalar_lea.hbm %s712_s1, %s248_s28  ;;  %s250_s4 = sshll.u32 %s560_s22, 4 }
  0x14   :  { %s290_s5 = scalar_lea.hbm %s15_s3, 16  ;;  %p293_p4 = scmp.lt.u32.totalorder %s15_s3, %s712_s1 }
  0x15   :  { %p291_p3 = scmp.ne.s32.totalorder %s15_s3, %s290_s5  ;;  %p294_p5 = scmp.lt.u32.totalorder %s579_s8, %s290_s5 }
  0x16   :  { %p296_p7 = scmp.lt.u32.totalorder %s290_s5, %s15_s3 }
  0x17   :  { %p295_p6 = por %p294_p5, %p293_p4 }
  0x19   :  { %p297_p8 = por %p296_p7, %p295_p6 }
  0x1b   :  { %p298_p9 = pnand %p297_p8, %p291_p3 }
  0x1d   :  { %301 = shalt.err (!%p298_p9)  }
  0x1e   :  { %s302_s11 = scalar_lea.vmem %s562_s21, 16  ;;  %s588_s12 = scalar_lea.vmem %s562_s21, 128 }
  0x1f   :  { %p303_p10 = scmp.ne.s32.totalorder %s562_s21, %s302_s11  ;;  %p307_p11 = scmp.lt.s32.totalorder %s562_s21, %s562_s21 }
  0x20   :  { %p308_p12 = scmp.lt.s32.totalorder %s588_s12, %s302_s11 }
  0x22   :  { %p309_p13 = por %p308_p12, %p307_p11 }
  0x24   :  { %p310_p0 = pnand %p309_p13, %p303_p10 }
  0x26   :  { %313 = shalt.err (!%p310_p0)  }
  0x27   :  { %26 = dma.hbm_to_vmem [thread:$0]  %s15_s3, 16, %s562_s21, [#allocation2] }
  0x28   :  { %s30_s15 = scalar_lea.hbm %s712_s1, %s250_s4  ;;  %s252_s16 = sshll.u32 %s564_s25, 4 }
  0x29   :  { %s314_s17 = scalar_lea.hbm %s30_s15, 16  ;;  %p317_p2 = scmp.lt.u32.totalorder %s30_s15, %s712_s1 }
  0x2a   :  { %p315_p1 = scmp.ne.s32.totalorder %s30_s15, %s314_s17  ;;  %p318_p3 = scmp.lt.u32.totalorder %s579_s8, %s314_s17 }
  0x2b   :  { %p320_p5 = scmp.lt.u32.totalorder %s314_s17, %s30_s15 }
  0x2c   :  { %p319_p4 = por %p318_p3, %p317_p2 }
  0x2e   :  { %p321_p6 = por %p320_p5, %p319_p4 }
  0x30   :  { %p322_p7 = pnand %p321_p6, %p315_p1 }
  0x32   :  { %325 = shalt.err (!%p322_p7)  }
  0x33   :  { %s326_s20 = scalar_lea.vmem %s566_s24, 16  ;;  %p331_p9 = scmp.lt.s32.totalorder %s566_s24, %s562_s21 }
  0x34   :  { %p327_p8 = scmp.ne.s32.totalorder %s566_s24, %s326_s20  ;;  %p332_p10 = scmp.lt.s32.totalorder %s588_s12, %s326_s20 }
  0x36   :  { %p333_p12 = por %p332_p10, %p331_p9 }
  0x38   :  { %p334_p13 = pnand %p333_p12, %p327_p8 }
  0x3a   :  { %337 = shalt.err (!%p334_p13)  }
  0x3b   :  { %43 = dma.hbm_to_vmem [thread:$0]  %s30_s15, 16, %s566_s24, [#allocation2 + $0x1] }
  0x3c   :  { %s47_s25 = scalar_lea.hbm %s712_s1, %s252_s16  ;;  %s254_s26 = sshll.u32 %s568_s27, 4 }
  0x3d   :  { %s338_s28 = scalar_lea.hbm %s47_s25, 16  ;;  %p341_p1 = scmp.lt.u32.totalorder %s47_s25, %s712_s1 }
  0x3e   :  { %p339_p0 = scmp.ne.s32.totalorder %s47_s25, %s338_s28  ;;  %p342_p2 = scmp.lt.u32.totalorder %s579_s8, %s338_s28 }
  0x3f   :  { %p344_p4 = scmp.lt.u32.totalorder %s338_s28, %s47_s25 }
  0x40   :  { %p343_p3 = por %p342_p2, %p341_p1 }
  0x42   :  { %p345_p5 = por %p344_p4, %p343_p3 }
  0x44   :  { %p346_p6 = pnand %p345_p5, %p339_p0 }
  0x46   :  { %349 = shalt.err (!%p346_p6)  }
  0x47   :  { %s350_s24 = scalar_lea.vmem %s570_s0, 16  ;;  %p355_p8 = scmp.lt.s32.totalorder %s570_s0, %s562_s21 }
  0x48   :  { %p351_p7 = scmp.ne.s32.totalorder %s570_s0, %s350_s24  ;;  %p356_p9 = scmp.lt.s32.totalorder %s588_s12, %s350_s24 }
  0x4a   :  { %p357_p10 = por %p356_p9, %p355_p8 }
  0x4c   :  { %p358_p12 = pnand %p357_p10, %p351_p7 }
  0x4e   :  { %361 = shalt.err (!%p358_p12)  }
  0x4f   :  { %60 = dma.hbm_to_vmem [thread:$0]  %s47_s25, 16, %s570_s0, [#allocation2 + $0x2] }
  0x50   :  { %s64_s4 = scalar_lea.hbm %s712_s1, %s254_s26  ;;  %s528_s5 = smov [#allocation5 + $0x3]  }
  0x51   :  { %s74_s6 = sshll.u32 %s528_s5, 4  ;;  %s628_s7 = sld [smem:[#allocation4 + $0x4]]  ;;  %s75_s6 = int_to_ptr.vmem [resolvable:$true] %s74_s6 }
  0x52   :  { %s362_s9 = scalar_lea.hbm %s64_s4, 16  ;;  %p365_p0 = scmp.lt.u32.totalorder %s64_s4, %s712_s1 }
  0x53   :  { %p363_p13 = scmp.ne.s32.totalorder %s64_s4, %s362_s9  ;;  %p366_p1 = scmp.lt.u32.totalorder %s579_s8, %s362_s9 }
  0x54   :  { %p368_p3 = scmp.lt.u32.totalorder %s362_s9, %s64_s4 }
  0x55   :  { %p367_p2 = por %p366_p1, %p365_p0 }
  0x57   :  { %p369_p4 = por %p368_p3, %p367_p2 }
  0x59   :  { %p370_p5 = pnand %p369_p4, %p363_p13 }
  0x5b   :  { %373 = shalt.err (!%p370_p5)  }
  0x5c   :  { %s374_s0 = scalar_lea.vmem %s75_s6, 16  ;;  %p379_p7 = scmp.lt.s32.totalorder %s75_s6, %s562_s21 }
  0x5d   :  { %p375_p6 = scmp.ne.s32.totalorder %s75_s6, %s374_s0  ;;  %p380_p8 = scmp.lt.s32.totalorder %s588_s12, %s374_s0 }
  0x5f   :  { %p381_p9 = por %p380_p8, %p379_p7 }
  0x61   :  { %p382_p10 = pnand %p381_p9, %p375_p6 }
  0x63   :  { %385 = shalt.err (!%p382_p10)  }
  0x64   :  { %77 = dma.hbm_to_vmem [thread:$0]  %s64_s4, 16, %s75_s6, [#allocation2 + $0x3] }
  0x65   :  { %s529_s13 = smov [#allocation5 + $0x4]   ;;  %s636_s15 = sld [smem:[#allocation4 + $0x5]] }
  0x66   :  { %s91_s14 = sshll.u32 %s529_s13, 4  ;;  %s530_s16 = smov [#allocation5 + $0x5]   ;;  %s92_s14 = int_to_ptr.vmem [resolvable:$true] %s91_s14 }
  0x67   :  { %s108_s17 = sshll.u32 %s530_s16, 4  ;;  %s638_s18 = sld [smem:[#allocation4 + $0x6]]  ;;  %s641_s17 = int_to_ptr.vmem [resolvable:$true] %s108_s17 }
  0x68   :  { %s256_s19 = sshll.u32 %s628_s7, 4 }
  0x69   :  { %s81_s23 = scalar_lea.hbm %s712_s1, %s256_s19 }
  0x6a   :  { %s386_s25 = scalar_lea.hbm %s81_s23, 16  ;;  %p389_p13 = scmp.lt.u32.totalorder %s81_s23, %s712_s1 }
  0x6b   :  { %p387_p12 = scmp.ne.s32.totalorder %s81_s23, %s386_s25  ;;  %p390_p0 = scmp.lt.u32.totalorder %s579_s8, %s386_s25 }
  0x6c   :  { %p392_p2 = scmp.lt.u32.totalorder %s386_s25, %s81_s23 }
  0x6d   :  { %p391_p1 = por %p390_p0, %p389_p13 }
  0x6f   :  { %p393_p3 = por %p392_p2, %p391_p1 }
  0x71   :  { %p394_p4 = pnand %p393_p3, %p387_p12 }
  0x73   :  { %397 = shalt.err (!%p394_p4)  }
  0x74   :  { %s398_s29 = scalar_lea.vmem %s92_s14, 16  ;;  %p403_p6 = scmp.lt.s32.totalorder %s92_s14, %s562_s21 }
  0x75   :  { %p399_p5 = scmp.ne.s32.totalorder %s92_s14, %s398_s29  ;;  %p404_p7 = scmp.lt.s32.totalorder %s588_s12, %s398_s29 }
  0x77   :  { %p405_p8 = por %p404_p7, %p403_p6 }
  0x79   :  { %p406_p9 = pnand %p405_p8, %p399_p5 }
  0x7b   :  { %409 = shalt.err (!%p406_p9)  }
  0x7c   :  { %94 = dma.hbm_to_vmem [thread:$0]  %s81_s23, 16, %s92_s14, [#allocation2 + $0x4] }
  0x7d   :  { %s258_s30 = sshll.u32 %s636_s15, 4  ;;  %s531_s24 = smov [#allocation5 + $0x6]  }
  0x7e   :  { %s125_s27 = sshll.u32 %s531_s24, 4  ;;  %s98_s5 = scalar_lea.hbm %s712_s1, %s258_s30  ;;  %s656_s27 = int_to_ptr.vmem [resolvable:$true] %s125_s27 }
  0x7f   :  { %s410_s6 = scalar_lea.hbm %s98_s5, 16  ;;  %p413_p12 = scmp.lt.u32.totalorder %s98_s5, %s712_s1 }
  0x80   :  { %p411_p10 = scmp.ne.s32.totalorder %s98_s5, %s410_s6  ;;  %p414_p13 = scmp.lt.u32.totalorder %s579_s8, %s410_s6 }
  0x81   :  { %p416_p1 = scmp.lt.u32.totalorder %s410_s6, %s98_s5 }
  0x82   :  { %p415_p0 = por %p414_p13, %p413_p12 }
  0x84   :  { %p417_p2 = por %p416_p1, %p415_p0 }
  0x86   :  { %p418_p3 = pnand %p417_p2, %p411_p10 }
  0x88   :  { %421 = shalt.err (!%p418_p3)  }
  0x89   :  { %s422_s10 = scalar_lea.vmem %s641_s17, 16  ;;  %p427_p5 = scmp.lt.s32.totalorder %s641_s17, %s562_s21 }
  0x8a   :  { %p423_p4 = scmp.ne.s32.totalorder %s641_s17, %s422_s10  ;;  %p428_p6 = scmp.lt.s32.totalorder %s588_s12, %s422_s10 }
  0x8c   :  { %p429_p7 = por %p428_p6, %p427_p5 }
  0x8e   :  { %p430_p8 = pnand %p429_p7, %p423_p4 }
  0x90   :  { %433 = shalt.err (!%p430_p8)  }
  0x91   :  { %111 = dma.hbm_to_vmem [thread:$0]  %s98_s5, 16, %s641_s17, [#allocation2 + $0x5] }
  0x92   :  { %s260_s11 = sshll.u32 %s638_s18, 4  ;;  %s261_s0 = sld [smem:[#allocation4 + $0x7]] }
  0x93   :  { %s115_s15 = scalar_lea.hbm %s712_s1, %s260_s11 }
  0x94   :  { %s434_s16 = scalar_lea.hbm %s115_s15, 16  ;;  %p437_p10 = scmp.lt.u32.totalorder %s115_s15, %s712_s1 }
  0x95   :  { %p435_p9 = scmp.ne.s32.totalorder %s115_s15, %s434_s16  ;;  %p438_p12 = scmp.lt.u32.totalorder %s579_s8, %s434_s16 }
  0x96   :  { %p440_p0 = scmp.lt.u32.totalorder %s434_s16, %s115_s15 }
  0x97   :  { %p439_p13 = por %p438_p12, %p437_p10 }
  0x99   :  { %p441_p1 = por %p440_p0, %p439_p13 }
  0x9b   :  { %p442_p2 = pnand %p441_p1, %p435_p9 }
  0x9d   :  { %445 = shalt.err (!%p442_p2)  }
  0x9e   :  { %s446_s17 = scalar_lea.vmem %s656_s27, 16  ;;  %p451_p4 = scmp.lt.s32.totalorder %s656_s27, %s562_s21 }
  0x9f   :  { %p447_p3 = scmp.ne.s32.totalorder %s656_s27, %s446_s17  ;;  %p452_p5 = scmp.lt.s32.totalorder %s588_s12, %s446_s17 }
  0xa1   :  { %p453_p6 = por %p452_p5, %p451_p4 }
  0xa3   :  { %p454_p7 = pnand %p453_p6, %p447_p3 }
  0xa5   :  { %457 = shalt.err (!%p454_p7)  }
  0xa6   :  { %128 = dma.hbm_to_vmem [thread:$0]  %s115_s15, 16, %s656_s27, [#allocation2 + $0x6] }
  0xa7   :  { %s532_s18 = smov [#allocation5 + $0x7]   ;;  %s262_s23 = sshll.u32 %s261_s0, 4 }
  0xa8   :  { %s142_s22 = sshll.u32 %s532_s18, 4  ;;  %s132_s28 = scalar_lea.hbm %s712_s1, %s262_s23  ;;  %s143_s22 = int_to_ptr.vmem [resolvable:$true] %s142_s22 }
  0xa9   :  { %s458_s29 = scalar_lea.hbm %s132_s28, 16  ;;  %p461_p9 = scmp.lt.u32.totalorder %s132_s28, %s712_s1 }
  0xaa   :  { %p459_p8 = scmp.ne.s32.totalorder %s132_s28, %s458_s29  ;;  %p462_p10 = scmp.lt.u32.totalorder %s579_s8, %s458_s29 }
  0xab   :  { %p464_p13 = scmp.lt.u32.totalorder %s458_s29, %s132_s28 }
  0xac   :  { %p463_p12 = por %p462_p10, %p461_p9 }
  0xae   :  { %p465_p0 = por %p464_p13, %p463_p12 }
  0xb0   :  { %p466_p1 = pnand %p465_p0, %p459_p8 }
  0xb2   :  { %469 = shalt.err (!%p466_p1)  }
  0xb3   :  { %s470_s27 = scalar_lea.vmem %s143_s22, 16  ;;  %p475_p3 = scmp.lt.s32.totalorder %s143_s22, %s562_s21 }
  0xb4   :  { %p471_p2 = scmp.ne.s32.totalorder %s143_s22, %s470_s27  ;;  %p476_p4 = scmp.lt.s32.totalorder %s588_s12, %s470_s27 }
  0xb6   :  { %p477_p5 = por %p476_p4, %p475_p3 }
  0xb8   :  { %p478_p6 = pnand %p477_p5, %p471_p2 }
  0xba   :  { %481 = shalt.err (!%p478_p6)  }
  0xbb   :  { %145 = dma.hbm_to_vmem [thread:$0]  %s132_s28, 16, %s143_s22, [#allocation2 + $0x7] }
  0xbc   :  { %506 = dma.done.wait [#allocation2], 16 }
  0xbd   :  { %507 = vsyncadd [#allocation2], 4294967280 }
  0xbe   :  { %508 = dma.done.wait [#allocation2 + $0x1], 16 }
  0xbf   :  { %509 = vsyncadd [#allocation2 + $0x1], 4294967280 }
  0xc0   :  { %510 = dma.done.wait [#allocation2 + $0x2], 16 }
  0xc1   :  { %511 = vsyncadd [#allocation2 + $0x2], 4294967280 }
  0xc2   :  { %512 = dma.done.wait [#allocation2 + $0x3], 16 }
  0xc3   :  { %513 = vsyncadd [#allocation2 + $0x3], 4294967280 }
  0xc4   :  { %514 = dma.done.wait [#allocation2 + $0x4], 16 }
  0xc5   :  { %515 = vsyncadd [#allocation2 + $0x4], 4294967280 }
  0xc6   :  { %516 = dma.done.wait [#allocation2 + $0x5], 16 }
  0xc7   :  { %517 = vsyncadd [#allocation2 + $0x5], 4294967280 }
  0xc8   :  { %518 = dma.done.wait [#allocation2 + $0x6], 16 }
  0xc9   :  { %519 = vsyncadd [#allocation2 + $0x6], 4294967280 }
  0xca   :  { %520 = dma.done.wait [#allocation2 + $0x7], 16 }
  0xcb   :  { %521 = vsyncadd [#allocation2 + $0x7], 4294967280  ;;  %p483_p7 = scmp.ne.s32.totalorder %s562_s21, %s588_s12  ;;  %p488_p8 = scmp.lt.s32.totalorder %s588_s12, %s588_s12 }
  0xcd   :  { %p489_p9 = por %p488_p8, %p307_p11 }
  0xcf   :  { %p490_p10 = pnand %p489_p9, %p483_p7 }
  0xd1   :  { %493 = shalt.err (!%p490_p10)
}
  0xd2   :  { %s494_s3 = scalar_lea.hbm %s713_s2, 128 }
  0xd3   :  { %p495_p12 = scmp.ne.s32.totalorder %s713_s2, %s494_s3  ;;  %p498_p13 = scmp.lt.u32.totalorder %s494_s3, %s713_s2 }
  0xd5   :  { %p500_p0 = pnand %p498_p13, %p495_p12 }
  0xd7   :  { %503 = shalt.err (!%p500_p0)
}
  0xd8   :  { %172 = dma.vmem_to_hbm [thread:$0]  %s562_s21, 128, %s713_s2, [#allocation6]  }
  0xd9   :  { %522 = dma.done.wait [#allocation6], 128  }
  0xda   :  { %523 = vsyncadd [#allocation6], 4294967168 }
  0xdb   :  { %176 = vsyncpa [#allocation6], 1 }
  0xdc   :  { %177 = vsyncmov [#allocation2] }
  0xdf   :  { %s178_s10 = vpop.sfrf %177 }
  0xe0   :  { %p263_p11 = scmp.ne.s32.totalorder %s178_s10, 0 }
  0xe2   :  { %182 = shalt.err (%p263_p11)  }
  0xe3   :  { %184 = vsyncmov [#allocation2 + $0x1] }
  0xe6   :  { %s185_s11 = vpop.sfrf %184 }
  0xe7   :  { %p264_p1 = scmp.ne.s32.totalorder %s185_s11, 0 }
  0xe9   :  { %189 = shalt.err (%p264_p1)  }
  0xea   :  { %191 = vsyncmov [#allocation2 + $0x2] }
  0xed   :  { %s192_s0 = vpop.sfrf %191 }
  0xee   :  { %p265_p2 = scmp.ne.s32.totalorder %s192_s0, 0 }
  0xf0   :  { %196 = shalt.err (%p265_p2)  }
  0xf1   :  { %198 = vsyncmov [#allocation2 + $0x3] }
  0xf4   :  { %s199_s13 = vpop.sfrf %198 }
  0xf5   :  { %p266_p3 = scmp.ne.s32.totalorder %s199_s13, 0 }
  0xf7   :  { %203 = shalt.err (%p266_p3)  }
  0xf8   :  { %205 = vsyncmov [#allocation2 + $0x4] }
  0xfb   :  { %s206_s2 = vpop.sfrf %205 }
  0xfc   :  { %p267_p4 = scmp.ne.s32.totalorder %s206_s2, 0 }
  0xfe   :  { %210 = shalt.err (%p267_p4)  }
  0xff   :  { %212 = vsyncmov [#allocation2 + $0x5] }
 0x102   :  { %s213_s21 = vpop.sfrf %212 }
 0x103   :  { %p268_p5 = scmp.ne.s32.totalorder %s213_s21, 0 }
 0x105   :  { %217 = shalt.err (%p268_p5)  }
 0x106   :  { %219 = vsyncmov [#allocation2 + $0x6] }
 0x109   :  { %s220_s14 = vpop.sfrf %219 }
 0x10a   :  { %p269_p6 = scmp.ne.s32.totalorder %s220_s14, 0 }
 0x10c   :  { %224 = shalt.err (%p269_p6)  }
 0x10d   :  { %226 = vsyncmov [#allocation2 + $0x7] }
 0x110   :  { %s227_s15 = vpop.sfrf %226 }
 0x111   :  { %p270_p7 = scmp.ne.s32.totalorder %s227_s15, 0 }
 0x113   :  { %231 = shalt.err (%p270_p7)  }

</bundles_post_ra>
